<compile_context>
chip_gen: v7x
topology: tpu7x:2x2x1
jax: 0.10.0
libtpu: 0.0.40
codegen_flags: <defaults>
</compile_context>

<pallas_src>
import jax
import jax.numpy as jnp
from jax import lax
from jax.experimental import pallas as pl
from jax.experimental.pallas import tpu as pltpu


def _round_up(x, m):
    return ((x + m - 1) // m) * m


def mlp_kernel(x_ref, w1_ref, b1_ref, w2_ref, b2_ref, w3_ref, b3_ref, o_ref):
    """Fused 3-layer MLP, feature-major compute.

    x_ref : (bt, Din)  batch-major activation block (pipelined)
    wN_ref: (out, in)  weights, whole in VMEM (bf16 fast path / f32)
    bN_ref: (out, 1)   f32 biases, whole in VMEM
    o_ref : (Dout, bt) transposed output block (lane-dense stores)
    """
    cdt = w1_ref.dtype                      # MXU compute dtype
    xt = x_ref[...].astype(cdt)             # cast in-kernel: no wrapper HBM pass
    b1 = b1_ref[...]
    b2 = b2_ref[...]
    b3 = b3_ref[...]

    # Layer 1: h1^T = W1 . x^T  — contract the Din axis of both operands
    # ("NT" matmul), putting the batch dim on lanes.
    nt = (((1,), (1,)), ((), ()))
    h = lax.dot_general(w1_ref[...], xt, nt, preferred_element_type=jnp.float32)
    h = jnp.maximum(h + b1, 0.0)
    # Layer 2: (H2, H1) @ (H1, bt)
    h = jnp.dot(w2_ref[...], h.astype(cdt), preferred_element_type=jnp.float32)
    h = jnp.maximum(h + b2, 0.0)
    # Layer 3: head, no activation.
    h = jnp.dot(w3_ref[...], h.astype(cdt), preferred_element_type=jnp.float32) + b3
    o_ref[...] = h.astype(o_ref.dtype)


def neural_network_forward(x, params, *, batch_tile=2048, use_bf16=True,
                           out_dtype=None):
    """Fused MLP forward. x: (B, D_in) float32. Returns (B, D_out)."""
    w1, b1, w2, b2, w3, b3 = params
    B, Din = x.shape
    H1 = w1.shape[1]
    H2 = w2.shape[1]
    Dout = w3.shape[1]
    out_dtype = jnp.dtype(out_dtype or x.dtype)

    # Weights/biases to kernel layout: PyTorch (out, in) weights in the MXU
    # dtype, (out, 1) f32 biases. ~30 KiB total; in production convert once,
    # not per call.
    cdt = jnp.bfloat16 if use_bf16 else jnp.float32
    w1k, w2k, w3k = (w.T.astype(cdt) for w in (w1, w2, w3))
    b1k, b2k, b3k = (b.astype(jnp.float32).reshape(-1, 1) for b in (b1, b2, b3))

    # Pad the batch only to the 16-row packing multiple (bf16 sublane pack),
    # never to the tile size. x itself is NOT cast/copied here.
    Bp = _round_up(B, 16)
    xp = jnp.pad(x, ((0, Bp - B), (0, 0))) if Bp != B else x

    # Tile choice: one step when the batch is small; >=2 "parallel" steps when
    # it is large enough to feed both v7x TensorCores; ragged last block is OK.
    batch_tile = max(128, _round_up(batch_tile, 128))
    if Bp <= batch_tile:
        bt = Bp
        if Bp >= 1024:
            bt = _round_up(pl.cdiv(Bp, 2), 128)
    else:
        bt = batch_tile
    grid = (pl.cdiv(Bp, bt),)

    # Weights/biases are grid-invariant: keep them whole in VMEM, outside the
    # double-buffered pipeline (single DMA, no per-step descriptor traffic).
    vmem_whole = pl.BlockSpec(memory_space=pltpu.MemorySpace.VMEM)

    flops = 2 * Bp * (Din * H1 + H1 * H2 + H2 * Dout)
    bytes_accessed = (
        Bp * Din * x.dtype.itemsize
        + Bp * Dout * out_dtype.itemsize
        + sum(int(a.size) * a.dtype.itemsize
              for a in (w1k, w2k, w3k, b1k, b2k, b3k))
    )

    out_t = pl.pallas_call(
        mlp_kernel,
        out_shape=jax.ShapeDtypeStruct((Dout, Bp), out_dtype),
        grid_spec=pltpu.PrefetchScalarGridSpec(
            num_scalar_prefetch=0,
            grid=grid,
            in_specs=[
                pl.BlockSpec((bt, Din), lambda i: (i, 0)),  # x: pipelined
                vmem_whole, vmem_whole,                     # w1, b1
                vmem_whole, vmem_whole,                     # w2, b2
                vmem_whole, vmem_whole,                     # w3, b3
            ],
            out_specs=pl.BlockSpec((Dout, bt), lambda i: (0, i)),  # lane-dense
        ),
        compiler_params=pltpu.CompilerParams(
            dimension_semantics=("parallel",),  # batch axis shards across TCs
        ),
        cost_estimate=pl.CostEstimate(
            flops=flops, transcendentals=0, bytes_accessed=bytes_accessed),
    )(xp, w1k, b1k, w2k, b2k, w3k, b3k)

    # Back to (B, Dout). Consumers that accept feature-major output can skip
    # this transpose entirely.
    return out_t[:, :B].T


def init_params(key, d_in=32, h1=64, h2=64, d_out=16, dtype=jnp.float32):
    """Deterministic synthetic init (kaiming-uniform-ish, like nn.Linear)."""
    ks = jax.random.split(key, 6)

    def lin(kw, kb, fan_in, fan_out):
        bound = 1.0 / jnp.sqrt(fan_in)
        w = jax.random.uniform(kw, (fan_in, fan_out), dtype, -bound, bound)
        b = jax.random.uniform(kb, (1, fan_out), dtype, -bound, bound)
        return w, b

    w1, b1 = lin(ks[0], ks[1], d_in, h1)
    w2, b2 = lin(ks[2], ks[3], h1, h2)
    w3, b3 = lin(ks[4], ks[5], h2, d_out)
    return (w1, b1, w2, b2, w3, b3)


def reference_forward(x, params):
    w1, b1, w2, b2, w3, b3 = params
    h = jnp.maximum(x @ w1 + b1, 0.0)
    h = jnp.maximum(h @ w2 + b2, 0.0)
    return h @ w3 + b3


if __name__ == "__main__":
    key = jax.random.PRNGKey(0)
    k_x, k_p = jax.random.split(key)

    B, D_IN = 8, 32
    x = jax.random.normal(k_x, (B, D_IN), jnp.float32)
    params = init_params(k_p, d_in=D_IN, h1=64, h2=64, d_out=16)
    ref = reference_forward(x, params)

    # Exact f32 MXU path (strict check).
    out_f32 = jax.block_until_ready(
        neural_network_forward(x, params, use_bf16=False))
    assert out_f32.shape == (B, 16)
    assert jnp.allclose(out_f32, ref, atol=1e-5, rtol=1e-5), "f32 mismatch"

    # bf16-MXU fast path: x cast in-kernel, f32 accumulation.
    out_bf16 = jax.block_until_ready(
        neural_network_forward(x, params, use_bf16=True))
    assert out_bf16.shape == (B, 16)
    assert jnp.allclose(out_bf16, ref, atol=5e-2, rtol=5e-2), "bf16 mismatch"

    # Ragged batch (pad only to 16 rows; no divisibility requirement).
    B2 = 13
    x2 = jax.random.normal(k_x, (B2, D_IN), jnp.float32)
    out2 = jax.block_until_ready(
        neural_network_forward(x2, params, use_bf16=False))
    ref2 = reference_forward(x2, params)
    assert out2.shape == (B2, 16)
    assert jnp.allclose(out2, ref2, atol=1e-5, rtol=1e-5), "ragged mismatch"

    # Multi-step grid with a ragged last block (exercises the tiled path).
    B3 = 300
    x3 = jax.random.normal(k_x, (B3, D_IN), jnp.float32)
    out3 = jax.block_until_ready(
        neural_network_forward(x3, params, use_bf16=False, batch_tile=128))
    ref3 = reference_forward(x3, params)
    assert out3.shape == (B3, 16)
    assert jnp.allclose(out3, ref3, atol=1e-5, rtol=1e-5), "tiled mismatch"

    print("KERNEL_OK")
</pallas_src>

<mosaic_0001>
module attributes {stable_mosaic.version = 11 : i64} {
  func.func @mlp_kernel(%arg0: i32, %arg1: memref<16x32xf32, #tpu.memory_space<vmem>>, %arg2: memref<64x32xf32, #tpu.memory_space<vmem>>, %arg3: memref<64x1xf32, #tpu.memory_space<vmem>>, %arg4: memref<64x64xf32, #tpu.memory_space<vmem>>, %arg5: memref<64x1xf32, #tpu.memory_space<vmem>>, %arg6: memref<16x64xf32, #tpu.memory_space<vmem>>, %arg7: memref<16x1xf32, #tpu.memory_space<vmem>>, %arg8: memref<16x16xf32, #tpu.memory_space<vmem>>) attributes {dimension_semantics = [#tpu.dimension_semantics<parallel>], iteration_bounds = array<i64: 1>, scalar_prefetch = 0 : i64, scratch_operands = 0 : i64, tpu.core_type = #tpu.core_type<tc>, window_params = [{transform_indices = @transform_0, window_bounds = array<i64: 16, 32>}, {pipeline_mode = #tpu.pipeline_mode<synchronous>, transform_indices = @transform_1, window_bounds = array<i64: 64, 32>}, {pipeline_mode = #tpu.pipeline_mode<synchronous>, transform_indices = @transform_2, window_bounds = array<i64: 64, 1>}, {pipeline_mode = #tpu.pipeline_mode<synchronous>, transform_indices = @transform_3, window_bounds = array<i64: 64, 64>}, {pipeline_mode = #tpu.pipeline_mode<synchronous>, transform_indices = @transform_4, window_bounds = array<i64: 64, 1>}, {pipeline_mode = #tpu.pipeline_mode<synchronous>, transform_indices = @transform_5, window_bounds = array<i64: 16, 64>}, {pipeline_mode = #tpu.pipeline_mode<synchronous>, transform_indices = @transform_6, window_bounds = array<i64: 16, 1>}, {transform_indices = @transform_7, window_bounds = array<i64: 16, 16>}]} {
    %c0 = arith.constant 0 : index
    %c0_0 = arith.constant 0 : index
    %0 = vector.load %arg1[%c0, %c0_0] : memref<16x32xf32, #tpu.memory_space<vmem>>, vector<16x32xf32>
    %c0_1 = arith.constant 0 : index
    %c0_2 = arith.constant 0 : index
    %1 = vector.load %arg3[%c0_1, %c0_2] : memref<64x1xf32, #tpu.memory_space<vmem>>, vector<64x1xf32>
    %c0_3 = arith.constant 0 : index
    %c0_4 = arith.constant 0 : index
    %2 = vector.load %arg5[%c0_3, %c0_4] : memref<64x1xf32, #tpu.memory_space<vmem>>, vector<64x1xf32>
    %c0_5 = arith.constant 0 : index
    %c0_6 = arith.constant 0 : index
    %3 = vector.load %arg7[%c0_5, %c0_6] : memref<16x1xf32, #tpu.memory_space<vmem>>, vector<16x1xf32>
    %c0_7 = arith.constant 0 : index
    %c0_8 = arith.constant 0 : index
    %4 = vector.load %arg2[%c0_7, %c0_8] : memref<64x32xf32, #tpu.memory_space<vmem>>, vector<64x32xf32>
    %cst = arith.constant dense<0.000000e+00> : vector<64x16xf32>
    %5 = tpu.matmul %4, %0, %cst {dimension_numbers = #tpu.dot_dimension_numbers<[1], [1], [0], [0], [0, 0, 1, 0], [], []>} : vector<64x32xf32>, vector<16x32xf32>, vector<64x16xf32> -> vector<64x16xf32>
    %6 = vector.broadcast %1 : vector<64x1xf32> to vector<64x16xf32>
    %7 = arith.addf %5, %6 : vector<64x16xf32>
    %cst_9 = arith.constant 0.000000e+00 : f32
    %8 = vector.broadcast %cst_9 : f32 to vector<64x16xf32>
    %9 = arith.maximumf %7, %8 : vector<64x16xf32>
    %c0_10 = arith.constant 0 : index
    %c0_11 = arith.constant 0 : index
    %10 = vector.load %arg4[%c0_10, %c0_11] : memref<64x64xf32, #tpu.memory_space<vmem>>, vector<64x64xf32>
    %cst_12 = arith.constant dense<0.000000e+00> : vector<64x16xf32>
    %11 = tpu.matmul %10, %9, %cst_12 {dimension_numbers = #tpu.dot_dimension_numbers<[1], [0], [0], [1], [0, 0, 1, 1], [], []>} : vector<64x64xf32>, vector<64x16xf32>, vector<64x16xf32> -> vector<64x16xf32>
    %12 = vector.broadcast %2 : vector<64x1xf32> to vector<64x16xf32>
    %13 = arith.addf %11, %12 : vector<64x16xf32>
    %cst_13 = arith.constant 0.000000e+00 : f32
    %14 = vector.broadcast %cst_13 : f32 to vector<64x16xf32>
    %15 = arith.maximumf %13, %14 : vector<64x16xf32>
    %c0_14 = arith.constant 0 : index
    %c0_15 = arith.constant 0 : index
    %16 = vector.load %arg6[%c0_14, %c0_15] : memref<16x64xf32, #tpu.memory_space<vmem>>, vector<16x64xf32>
    %cst_16 = arith.constant dense<0.000000e+00> : vector<16x16xf32>
    %17 = tpu.matmul %16, %15, %cst_16 {dimension_numbers = #tpu.dot_dimension_numbers<[1], [0], [0], [1], [0, 0, 1, 1], [], []>} : vector<16x64xf32>, vector<64x16xf32>, vector<16x16xf32> -> vector<16x16xf32>
    %18 = vector.broadcast %3 : vector<16x1xf32> to vector<16x16xf32>
    %19 = arith.addf %17, %18 : vector<16x16xf32>
    %c0_17 = arith.constant 0 : index
    %c0_18 = arith.constant 0 : index
    %20 = vector.load %arg8[%c0_17, %c0_18] : memref<16x16xf32, #tpu.memory_space<vmem>>, vector<16x16xf32>
    tpu.vector_store %arg8[%c0_17, %c0_18], %19 {strides = array<i32>} : memref<16x16xf32, #tpu.memory_space<vmem>>, vector<16x16xf32>,
    return
  }
  func.func @transform_0(%arg0: i32) -> (i32, i32) {
    %c0_i32 = arith.constant 0 : i32
    %c0_i32_0 = arith.constant 0 : i32
    return %arg0, %c0_i32 : i32, i32
  }
  func.func @transform_1(%arg0: i32) -> (i32, i32) {
    %c0_i32 = arith.constant 0 : i32
    %c0_i32_0 = arith.constant 0 : i32
    %c0_i32_1 = arith.constant 0 : i32
    return %c0_i32, %c0_i32_0 : i32, i32
  }
  func.func @transform_2(%arg0: i32) -> (i32, i32) {
    %c0_i32 = arith.constant 0 : i32
    %c0_i32_0 = arith.constant 0 : i32
    %c0_i32_1 = arith.constant 0 : i32
    return %c0_i32, %c0_i32_0 : i32, i32
  }
  func.func @transform_3(%arg0: i32) -> (i32, i32) {
    %c0_i32 = arith.constant 0 : i32
    %c0_i32_0 = arith.constant 0 : i32
    %c0_i32_1 = arith.constant 0 : i32
    return %c0_i32, %c0_i32_0 : i32, i32
  }
  func.func @transform_4(%arg0: i32) -> (i32, i32) {
    %c0_i32 = arith.constant 0 : i32
    %c0_i32_0 = arith.constant 0 : i32
    %c0_i32_1 = arith.constant 0 : i32
    return %c0_i32, %c0_i32_0 : i32, i32
  }
  func.func @transform_5(%arg0: i32) -> (i32, i32) {
    %c0_i32 = arith.constant 0 : i32
    %c0_i32_0 = arith.constant 0 : i32
    %c0_i32_1 = arith.constant 0 : i32
    return %c0_i32, %c0_i32_0 : i32, i32
  }
  func.func @transform_6(%arg0: i32) -> (i32, i32) {
    %c0_i32 = arith.constant 0 : i32
    %c0_i32_0 = arith.constant 0 : i32
    %c0_i32_1 = arith.constant 0 : i32
    return %c0_i32, %c0_i32_0 : i32, i32
  }
  func.func @transform_7(%arg0: i32) -> (i32, i32) {
    %c0_i32 = arith.constant 0 : i32
    %c0_i32_0 = arith.constant 0 : i32
    return %c0_i32, %arg0 : i32, i32
  }
}

</mosaic_0001>

<bundles_post_ra>
// kernel: tpu_custom_call.1
= control target key start
LH: loop header
LB: loop body
LE: loop exit
PB: predicated region body
PF: predicated region fallthrough
CT: control target
= control target key end

     0   :  { %vm95_vm0 = vcmask 261120   ;;  %v724_v4 = vmov 0   ;;  %s914_s0 = inlined_call_operand.vmem [shape: f32[16,32], index: 0, kind: input, shape index: {}]   ;;  %s915_s1 = inlined_call_operand.vmem [shape: f32[64,32], index: 1, kind: input, shape index: {}]   ;;  %s916_s2 = inlined_call_operand.vmem [shape: f32[64,1], index: 2, kind: input, shape index: {}]   ;;  %s917_s3 = inlined_call_operand.vmem [shape: f32[64,64], index: 3, kind: input, shape index: {}]   ;;  %s918_s4 = inlined_call_operand.vmem [shape: f32[64,1], index: 4, kind: input, shape index: {}]   ;;  %s919_s5 = inlined_call_operand.vmem [shape: f32[16,64], index: 5, kind: input, shape index: {}]   ;;  %s920_s6 = inlined_call_operand.vmem [shape: f32[16,1], index: 6, kind: input, shape index: {}]   ;;  %s921_s7 = inlined_call_operand.hbm [shape: f32[16,16], index: 7, kind: output, shape index: {}]  }
   0x1   :  { %v27_v0 = vld [vmem:[%s914_s0] sm:$0xff]  ;;  %v28_v1 = vld [vmem:[%s914_s0 + $0x8] sm:$0xff]  ;;  %vm657_vm1 = vmpackc.low %vm95_vm0, %vm95_vm0  ;;  %698 = vset.pattern.permute.xlu0 %v724_v4  ;;  %699 = vset.pattern.permute.xlu1 %v724_v4 }
   0x2   :  { %v47_v2 = vld [vmem:[%s915_s1] sm:$0xff]  ;;  %v656_v3 = vpack.c.bf16 %v28_v1, %v27_v0  ;;  %v31_v6 = vld [vmem:[%s916_s2 + $0x10] sm:$0xff]  ;;  %v30_v7 = vld [vmem:[%s916_s2 + $0x8] sm:$0xff] }
   0x3   :  { %597 = vmatprep.mubr.msk.f32.mxu0 %vm95_vm0, %v47_v2  ;;  %v29_v5 = vld [vmem:[%s916_s2] sm:$0xff]  ;;  %67 = vperm.xlu1 %699, %v31_v6   ;;  %v32_v8 = vld [vmem:[%s916_s2 + $0x18] sm:$0xff]  ;;  %v48_v9 = vld [vmem:[%s915_s1 + $0x8] sm:$0xff] }
   0x4   :  { %658 = vmatprep.subr.msk.bf16.mxu0 %vm657_vm1, %v656_v3  ;;  %57 = vperm.xlu0 %698, %v29_v5   ;;  %v49_v10 = vld [vmem:[%s915_s1 + $0x10] sm:$0xff]  ;;  %v33_v11 = vld [vmem:[%s916_s2 + $0x20] sm:$0xff] }
   0x5   :  { %661 = vmatpush3.bf16.xpose.msk.msra.mxu0 %vm657_vm1, %v656_v3 }
   0x7   :  { %72 = vperm.xlu1 %699, %v32_v8  }
   0x8   :  { %62 = vperm.xlu0 %698, %v30_v7  }
   0x9   :  { %12 = vsyncpa [#allocation3], 0  ;;  %v34_v12 = vld [vmem:[%s916_s2 + $0x28] sm:$0xff]  ;;  %v50_v13 = vld [vmem:[%s915_s1 + $0x18] sm:$0xff]  ;;  %vm287_vm2 = vcmask 523264   ;;  %vm518_vm3 = vcmask 130048  }
   0xa   :  { %v51_v14 = vld [vmem:[%s915_s1 + $0x20] sm:$0xff]  ;;  %v35_v15 = vld [vmem:[%s916_s2 + $0x30] sm:$0xff]  ;;  %v36_v16 = vld [vmem:[%s916_s2 + $0x38] sm:$0xff] }
   0xb   :  { %82 = vperm.xlu1 %699, %v34_v12   ;;  %v52_v17 = vld [vmem:[%s915_s1 + $0x28] sm:$0xff]  ;;  %v53_v18 = vld [vmem:[%s915_s1 + $0x30] sm:$0xff]  ;;  %v37_v19 = vld [vmem:[%s918_s4] sm:$0xff] }
   0xc   :  { %598 = vmatmul.mubr.msk.f32.vlgmr.msra.gmra.mrb[0].mxu0 %vm95_vm0, %v48_v9  ;;  %77 = vperm.xlu0 %698, %v33_v11   ;;  %v38_v20 = vld [vmem:[%s918_s4 + $0x8] sm:$0xff]  ;;  %v54_v21 = vld [vmem:[%s915_s1 + $0x38] sm:$0xff]  ;;  %v39_v22 = vld [vmem:[%s918_s4 + $0x10] sm:$0xff]  ;;  %s725_s1 = smov [#allocation2]  }
   0xd   :  { %600 = vmatprep.mubr.msk.f32.mxu0 %vm95_vm0, %v49_v10  ;;  %v40_v23 = vld [vmem:[%s918_s4 + $0x18] sm:$0xff]  ;;  %v41_v24 = vld [vmem:[%s918_s4 + $0x20] sm:$0xff]  ;;  %v42_v25 = vld [vmem:[%s918_s4 + $0x28] sm:$0xff]  ;;  %s526_s22 = sshll.u32 %s725_s1, 4  ;;  %s527_s22 = int_to_ptr.vmem [resolvable:$true] %s526_s22 }
   0xe   :  { %v43_v26 = vld [vmem:[%s918_s4 + $0x30] sm:$0xff]  ;;  %v44_v27 = vld [vmem:[%s918_s4 + $0x38] sm:$0xff]  ;;  %v45_v28 = vld [vmem:[%s920_s6] sm:$0xff]  ;;  %s700_s23 = scalar_lea.vmem %s527_s22, 256  ;;  %p705_p1 = scmp.lt.s32.totalorder %s527_s22, %s527_s22 }
   0xf   :  { %92 = vperm.xlu1 %699, %v36_v16   ;;  %v46_v29 = vld [vmem:[%s920_s6 + $0x8] sm:$0xff]  ;;  %v239_v30 = vld [vmem:[%s917_s3] sm:$0xff]  ;;  %v241_v4 = vld [vmem:[%s917_s3 + $0x10] sm:$0xff]  ;;  %p701_p0 = scmp.ne.s32.totalorder %s527_s22, %s700_s23  ;;  %p706_p2 = scmp.lt.s32.totalorder %s700_s23, %s700_s23 }
  0x10   :  { %601 = vmatmul.mubr.msk.f32.gmra.mrb[2].mxu0 %vm95_vm0, %v50_v13  ;;  %87 = vperm.xlu0 %698, %v35_v15   ;;  %v240_v3 = vld [vmem:[%s917_s3 + $0x8] sm:$0xff]  ;;  %v242_v5 = vld [vmem:[%s917_s3 + $0x18] sm:$0xff]  ;;  %v243_v6 = vld [vmem:[%s917_s3 + $0x20] sm:$0xff] }
  0x11   :  { %603 = vmatprep.mubr.msk.f32.mxu0 %vm95_vm0, %v51_v14  ;;  %625 = vmatprep.mubr.msk.f32.mxu1 %vm287_vm2, %v239_v30  ;;  %v244_v7 = vld [vmem:[%s917_s3 + $0x28] sm:$0xff]  ;;  %v245_v8 = vld [vmem:[%s917_s3 + $0x30] sm:$0xff]  ;;  %v246_v9 = vld [vmem:[%s917_s3 + $0x38] sm:$0xff]  ;;  %p707_p3 = por %p706_p2, %p705_p1 }
  0x12   :  { %v425_v10 = vld [vmem:[%s919_s5] sm:$0xff] }
  0x13   :  { %254 = vperm.xlu1 %699, %v38_v20   ;;  %p708_p4 = pnand %p707_p3, %p701_p0 }
  0x14   :  { %604 = vmatmul.mubr.msk.f32.gmra.mrb[4].mxu0 %vm95_vm0, %v52_v17  ;;  %249 = vperm.xlu0 %698, %v37_v19  }
  0x15   :  { %606 = vmatprep.mubr.msk.f32.mxu0 %vm95_vm0, %v53_v18 }
  0x17   :  { %264 = vperm.xlu1 %699, %v40_v23  }
  0x18   :  { %607 = vmatmul.mubr.msk.f32.gmra.mrb[6].mxu0 %vm95_vm0, %v54_v21  ;;  %259 = vperm.xlu0 %698, %v39_v22  }
  0x19   :  { %653 = vmatprep.mubr.msk.f32.mxu0 %vm287_vm2, %v425_v10 }
  0x1b   :  { %274 = vperm.xlu1 %699, %v42_v25  }
  0x1c   :  { %269 = vperm.xlu0 %698, %v41_v24  }
  0x1f   :  { %284 = vperm.xlu1 %699, %v44_v27  }
  0x20   :  { %279 = vperm.xlu0 %698, %v43_v26  }
  0x23   :  { %434 = vperm.xlu1 %699, %v46_v29  }
  0x24   :  { %429 = vperm.xlu0 %698, %v45_v28  }
  0x82   :  { %v68_v32 = vpop.permute.xlu1 %67 }
  0x83   :  { %v58_v31 = vpop.permute.xlu0 %57 }
  0x86   :  { %v73_v34 = vpop.permute.xlu1 %72 }
  0x87   :  { %v63_v33 = vpop.permute.xlu0 %62 }
  0x8a   :  { %v83_v44 = vpop.permute.xlu1 %82 }
  0x8b   :  { %v78_v47 = vpop.permute.xlu0 %77 }
  0x8e   :  { %v93_v56 = vpop.permute.xlu1 %92 }
  0x8f   :  { %v88_v59 = vpop.permute.xlu0 %87 }
  0x92   :  { %v255_v11 = vpop.permute.xlu1 %254 }
  0x93   :  { %v250_v12 = vpop.permute.xlu0 %249 }
  0x96   :  { %v265_v13 = vpop.permute.xlu1 %264 }
  0x97   :  { %v260_v15 = vpop.permute.xlu0 %259 }
  0x9a   :  { %v275_v24 = vpop.permute.xlu1 %274 }
  0x9b   :  { %v270_v27 = vpop.permute.xlu0 %269 }
  0xdf   :  { %v599_v35 = vpop.f32.mrb[0].mxu0 }
  0xe0   :  { %v198_v36 = vadd.f32 %v599_v35, %v63_v33  ;;  %v192_v37 = vpop.f32.mrb[1].mxu0 }
  0xe1   :  { %v193_v38 = vadd.f32 %v192_v37, %v58_v31 }
  0xe2   :  { %v232_v39 = vmax.f32 %v198_v36, 0.0  ;;  %v285_v36 = vpop.permute.xlu1 %284 }
  0xe3   :  { %v231_v40 = vmax.f32 %v193_v38, 0.0  ;;  %v602_v41 = vpop.f32.mrb[2].mxu0 }
  0xe4   :  { %v208_v42 = vadd.f32 %v602_v41, %v73_v34  ;;  %v202_v43 = vpop.f32.mrb[3].mxu0 }
  0xe5   :  { %v203_v45 = vadd.f32 %v202_v43, %v68_v32  ;;  %v662_v46 = vpack.c.bf16 %v232_v39, %v231_v40  ;;  %v280_v39 = vpop.permute.xlu0 %279 }
  0xe6   :  { %v234_v48 = vmax.f32 %v208_v42, 0.0 }
  0xe7   :  { %v233_v49 = vmax.f32 %v203_v45, 0.0  ;;  %v605_v50 = vpop.f32.mrb[4].mxu0  ;;  %663 = vmatprep.subr.bf16.mxu1 %v662_v46 }
  0xe8   :  { %v218_v51 = vadd.f32 %v605_v50, %v83_v44  ;;  %v212_v52 = vpop.f32.mrb[5].mxu0  ;;  %665 = vmatpush3.bf16.msra.mxu1 %v662_v46 }
  0xe9   :  { %v666_v53 = vpack.c.bf16 %v234_v48, %v233_v49  ;;  %v213_v54 = vadd.f32 %v212_v52, %v78_v47  ;;  %v426_v47 = vld [vmem:[%s919_s5 + $0x8] sm:$0xff]  ;;  %v435_v48 = vpop.permute.xlu1 %434  ;;  %v430_v50 = vpop.permute.xlu0 %429 }
  0xea   :  { %v236_v55 = vmax.f32 %v218_v51, 0.0 }
  0xeb   :  { %v235_v57 = vmax.f32 %v213_v54, 0.0  ;;  %v608_v58 = vpop.f32.mrb[6].mxu0  ;;  %667 = vmatprep.subr.bf16.mxu1 %v666_v53 }
  0xec   :  { %v228_v60 = vadd.f32 %v608_v58, %v93_v56  ;;  %v222_v61 = vpop.f32.mrb[7].mxu0  ;;  %669 = vmatpush3.bf16.msra.mxu1 %v666_v53 }
  0xed   :  { %v670_v62 = vpack.c.bf16 %v236_v55, %v235_v57  ;;  %v223_v63 = vadd.f32 %v222_v61, %v88_v59 }
  0xee   :  { %v238_v0 = vmax.f32 %v228_v60, 0.0 }
  0xef   :  { %v237_v1 = vmax.f32 %v223_v63, 0.0  ;;  %671 = vmatprep.subr.bf16.mxu1 %v670_v62 }
  0xf0   :  { %673 = vmatpush3.bf16.msra.mxu1 %v670_v62 }
  0xf1   :  { %v674_v2 = vpack.c.bf16 %v238_v0, %v237_v1 }
  0xf3   :  { %675 = vmatprep.subr.bf16.mxu1 %v674_v2 }
  0xf4   :  { %677 = vmatpush3.bf16.msra.mxu1 %v674_v2 }
  0xf7   :  { %626 = vmatmul.mubr.msk.f32.vlgmr.msra.gmra.mrb[0].mxu1 %vm287_vm2, %v240_v3 }
  0xf8   :  { %628 = vmatprep.mubr.msk.f32.mxu1 %vm287_vm2, %v241_v4 }
  0xfb   :  { %629 = vmatmul.mubr.msk.f32.gmra.mrb[2].mxu1 %vm287_vm2, %v242_v5 }
  0xfc   :  { %631 = vmatprep.mubr.msk.f32.mxu1 %vm287_vm2, %v243_v6 }
  0xff   :  { %632 = vmatmul.mubr.msk.f32.gmra.mrb[4].mxu1 %vm287_vm2, %v244_v7 }
 0x100   :  { %634 = vmatprep.mubr.msk.f32.mxu1 %vm287_vm2, %v245_v8 }
 0x103   :  { %635 = vmatmul.mubr.msk.f32.gmra.mrb[6].mxu1 %vm287_vm2, %v246_v9 }
 0x1ca   :  { %v627_v14 = vpop.f32.mrb[0].mxu1 }
 0x1cb   :  { %v384_v16 = vadd.f32 %v627_v14, %v255_v11  ;;  %v378_v17 = vpop.f32.mrb[1].mxu1 }
 0x1cc   :  { %v379_v18 = vadd.f32 %v378_v17, %v250_v12 }
 0x1cd   :  { %v418_v19 = vmax.f32 %v384_v16, 0.0 }
 0x1ce   :  { %v417_v20 = vmax.f32 %v379_v18, 0.0  ;;  %v630_v21 = vpop.f32.mrb[2].mxu1 }
 0x1cf   :  { %v394_v22 = vadd.f32 %v630_v21, %v265_v13  ;;  %v388_v23 = vpop.f32.mrb[3].mxu1 }
 0x1d0   :  { %v678_v25 = vpack.c.bf16 %v418_v19, %v417_v20  ;;  %v389_v26 = vadd.f32 %v388_v23, %v260_v15 }
 0x1d1   :  { %v420_v28 = vmax.f32 %v394_v22, 0.0 }
 0x1d2   :  { %v419_v29 = vmax.f32 %v389_v26, 0.0  ;;  %v633_v30 = vpop.f32.mrb[4].mxu1  ;;  %679 = vmatprep.subr.bf16.mxu0 %v678_v25 }
 0x1d3   :  { %v404_v31 = vadd.f32 %v633_v30, %v275_v24  ;;  %v398_v32 = vpop.f32.mrb[5].mxu1  ;;  %681 = vmatpush3.bf16.msra.mxu0 %v678_v25 }
 0x1d4   :  { %v682_v33 = vpack.c.bf16 %v420_v28, %v419_v29  ;;  %v399_v34 = vadd.f32 %v398_v32, %v270_v27 }
 0x1d5   :  { %v422_v35 = vmax.f32 %v404_v31, 0.0 }
 0x1d6   :  { %v421_v37 = vmax.f32 %v399_v34, 0.0  ;;  %v636_v38 = vpop.f32.mrb[6].mxu1  ;;  %683 = vmatprep.subr.bf16.mxu0 %v682_v33 }
 0x1d7   :  { %v414_v40 = vadd.f32 %v636_v38, %v285_v36  ;;  %v408_v41 = vpop.f32.mrb[7].mxu1  ;;  %685 = vmatpush3.bf16.msra.mxu0 %v682_v33 }
 0x1d8   :  { %v686_v42 = vpack.c.bf16 %v422_v35, %v421_v37  ;;  %v409_v43 = vadd.f32 %v408_v41, %v280_v39 }
 0x1d9   :  { %v424_v44 = vmax.f32 %v414_v40, 0.0 }
 0x1da   :  { %v423_v45 = vmax.f32 %v409_v43, 0.0  ;;  %687 = vmatprep.subr.bf16.mxu0 %v686_v42 }
 0x1db   :  { %689 = vmatpush3.bf16.msra.mxu0 %v686_v42 }
 0x1dc   :  { %v690_v46 = vpack.c.bf16 %v424_v44, %v423_v45 }
 0x1de   :  { %691 = vmatprep.subr.bf16.mxu0 %v690_v46 }
 0x1df   :  { %693 = vmatpush3.bf16.msra.mxu0 %v690_v46 }
 0x1e2   :  { %654 = vmatmul.mubr.msk.f32.vlgmr.msra.gmra.mrb[8].mxu0 %vm287_vm2, %v426_v47 }
 0x2b5   :  { %v655_v49 = vpop.f32.mrb[8].mxu0 }
 0x2b6   :  { %v515_v51 = vadd.f32 %v655_v49, %v435_v48  ;;  %v509_v52 = vpop.f32.mrb[9].mxu0 }
 0x2b7   :  { %v510_v53 = vadd.f32 %v509_v52, %v430_v50 }
 0x2b8   :  { %520 = vst.msk [vmem:[#allocation2 + $0x8] sm:$0xff] %vm518_vm3, %v515_v51 }
 0x2b9   :  { %519 = vst.msk [vmem:[#allocation2] sm:$0xff] %vm518_vm3, %v510_v53 }
 0x2ba   :  { %711 = shalt.err (!%p708_p4)
}
 0x2bb   :  { %s712_s25 = scalar_lea.hbm %s921_s7, 256 }
 0x2bc   :  { %p713_p5 = scmp.ne.s32.totalorder %s921_s7, %s712_s25  ;;  %p716_p6 = scmp.lt.u32.totalorder %s712_s25, %s921_s7 }
 0x2be   :  { %p718_p7 = pnand %p716_p6, %p713_p5 }
 0x2c0   :  { %721 = shalt.err (!%p718_p7)
}
 0x2c1   :  { %s726_s30 = smov 128   ;;  %s727_s8 = smov 8  }
 0x2c2   :  { %532 = dma.vmem_to_hbm [thread:$0]  %s527_s22, 256, %s921_s7, [#allocation3], %s726_s30, %s726_s30, %s727_s8  }
 0x2c3   :  { %722 = dma.done.wait [#allocation3], 256  }
 0x2c4   :  { %723 = vsyncadd [#allocation3], 4294967040 }
 0x2c5   :  { %536 = vsyncpa [#allocation3], 1 }

</bundles_post_ra>
